<compile_context>
chip_gen: v7x
topology: tpu7x:2x2x1
jax: 0.10.0
libtpu: 0.0.40
codegen_flags: <defaults>
</compile_context>

<pallas_src>
import functools
import math

import jax
import jax.numpy as jnp
from jax.experimental import pallas as pl
from jax.experimental.pallas import tpu as pltpu


_LANE = 128
_SUBLANE = 8
# Conservative VMEM budget: fits v7x's 64 MiB physical VMEM with headroom and
# is well inside v5e/v6e's 128 MiB.
_VMEM_BUDGET = 56 * 1024 * 1024


def _round_up(x, m):
    return ((x + m - 1) // m) * m


def _cdiv(a, b):
    return (a + b - 1) // b


def _coverage_gru_kernel(cov_ref, xo_ref, wc_ref, wo_ref, bc_ref, out_ref, *, hp):
    """One row-tile of the CoverageGRU cell.

    cov_ref : [TN, HP]     coverage rows (zero-padded to HP lanes), compute dtype
    xo_ref  : [TN, KP]     concat(enHidden, deHidden, attention, 1, 0-pad)
    wc_ref  : [HP, 3*HP]   coverage weight; z/r/n chunks each HP wide (lane-aligned)
    wo_ref  : [KP, 3*HP]   stacked [We^T; Wd^T; wa; b_att+b_en+b_de; 0-pad]
    bc_ref  : [1, 3*HP]    coverage bias (f32), chunk-padded
    out_ref : [TN, HP]
    """
    cov = cov_ref[...]

    # Two MXU sequences total; accumulate in f32.
    gate_cov = (jnp.dot(cov, wc_ref[...], preferred_element_type=jnp.float32)
                + bc_ref[...])                                     # [TN, 3HP]
    cov_n = gate_cov[:, 2 * hp:]                                   # multiplied by r
    gate = gate_cov + jnp.dot(xo_ref[...], wo_ref[...],
                              preferred_element_type=jnp.float32)  # summed gates

    # sigmoid via tanh: single EUP op each, no VPU divide.
    z = 0.5 * (jnp.tanh(0.5 * gate[:, :hp]) + 1.0)
    r = 0.5 * (jnp.tanh(0.5 * gate[:, hp:2 * hp]) + 1.0)
    # r*cov_n + oth_n == (r - 1)*cov_n + (cov_n + oth_n)
    new_cov = jnp.tanh((r - 1.0) * cov_n + gate[:, 2 * hp:])

    covf = cov.astype(jnp.float32)
    # (1-z)*new + z*cov == new - z*(new - cov)
    out_ref[...] = (new_cov - z * (new_cov - covf)).astype(out_ref.dtype)


def pack_coverage_gru_params(params, *, compute_dtype=jnp.bfloat16):
    """Pack raw (transposed) parameters once for the kernel.

    * z/r/n output chunks are padded to HP = round_up(H, 128) so in-kernel
      chunk slices and the output store are lane-aligned / lane-dense.
    * We^T, Wd^T, the rank-1 attention row and the folded other-bias are
      stacked into ONE [KP, 3*HP] matrix (bias rides on a ones-column) so the
      whole non-coverage path is a single MXU dot.
    * Weights are stored in `compute_dtype` (bf16 by default); the coverage
      bias stays f32 since it is added after the f32 accumulation.
    """
    h = params["wc_t"].shape[0]
    hp = _round_up(h, _LANE)

    def pad_chunks(w):                    # [in, 3h] -> [in, 3hp], chunk-aligned
        w3 = w.reshape(w.shape[0], 3, h)
        w3 = jnp.pad(w3, ((0, 0), (0, 0), (0, hp - h)))
        return w3.reshape(w.shape[0], 3 * hp)

    wc = jnp.pad(pad_chunks(params["wc_t"]), ((0, hp - h), (0, 0)))     # [HP, 3HP]
    b_cov = pad_chunks(params["b_cov"]).astype(jnp.float32)             # [1, 3HP]
    b_other = pad_chunks(params["b_att"] + params["b_en"] + params["b_de"])

    w_other = jnp.concatenate(
        [pad_chunks(params["we_t"]), pad_chunks(params["wd_t"]),
         pad_chunks(params["wa_t"]), b_other], axis=0)                  # [2I+2, 3HP]
    kp = _round_up(w_other.shape[0], _SUBLANE)
    w_other = jnp.pad(w_other, ((0, kp - w_other.shape[0]), (0, 0)))

    return {"wc": wc.astype(compute_dtype),
            "w_other": w_other.astype(compute_dtype),
            "b_cov": b_cov}


def _vmem_bytes(tile_n, hp, kp, act_bytes, out_bytes):
    klanes = _round_up(kp, _LANE)
    stream = 2 * tile_n * (hp * act_bytes + klanes * act_bytes + hp * out_bytes)
    weights = 2 * ((hp + kp) * 3 * hp * act_bytes + _SUBLANE * 3 * hp * 4)
    interm = 12 * tile_n * hp * 4          # f32 gates + epilogue temporaries
    return stream + weights + interm


def coverage_gru_forward(coverage, attention, enHidden, deHidden, packed,
                         *, max_tile_rows=1024):
    """coverage [N,H], attention [N,1], enHidden [N,I], deHidden [N,I] -> [N,H]."""
    n, h = coverage.shape
    hp = _round_up(h, _LANE)
    kp = packed["w_other"].shape[0]
    cdt = packed["wc"].dtype
    out_dtype = coverage.dtype
    act_bytes = jnp.dtype(cdt).itemsize
    out_bytes = jnp.dtype(out_dtype).itemsize

    # Balanced row tiles (padding <= 7 rows), shrunk to fit the VMEM budget,
    # then split to >= 2 grid steps when possible (v7x megacore).
    tile_n = _round_up(_cdiv(n, max(1, _cdiv(n, max_tile_rows))), _SUBLANE)
    while (tile_n > _SUBLANE
           and _vmem_bytes(tile_n, hp, kp, act_bytes, out_bytes) > _VMEM_BUDGET):
        tile_n = _round_up(tile_n // 2, _SUBLANE)
    if _cdiv(n, tile_n) < 2 and tile_n >= 2 * _SUBLANE:
        tile_n = _round_up(_cdiv(tile_n, 2), _SUBLANE)
    n_pad = _round_up(n, tile_n)
    grid = (n_pad // tile_n,)

    # TODO(synk): for very large H on v7x (resident weights alone > ~56 MiB) a
    # second grid axis over the 3H gate columns is needed; not implemented here.
    est = _vmem_bytes(tile_n, hp, kp, act_bytes, out_bytes)
    vmem_limit = int(min(max(int(est * 1.25) + (2 << 20), 32 << 20), 127 << 20))

    # Lane-dense activation slabs in the compute dtype; one concat replaces the
    # separate en/de/att streams (and removes the [N,1] attention tile).
    cov_p = jnp.pad(coverage.astype(cdt), ((0, n_pad - n), (0, hp - h)))
    x_other = jnp.concatenate(
        [enHidden.astype(cdt), deHidden.astype(cdt), attention.astype(cdt),
         jnp.ones((n, 1), cdt)], axis=1)
    x_other = jnp.pad(x_other, ((0, n_pad - n), (0, kp - x_other.shape[1])))

    out = pl.pallas_call(
        functools.partial(_coverage_gru_kernel, hp=hp),
        out_shape=jax.ShapeDtypeStruct((n_pad, hp), out_dtype),
        grid=grid,
        in_specs=[
            pl.BlockSpec((tile_n, hp), lambda b: (b, 0)),    # coverage rows
            pl.BlockSpec((tile_n, kp), lambda b: (b, 0)),    # en|de|att|1 rows
            # Resident (constant index_map) weights; on v7x with very large H
            # these could additionally use pipeline_mode=pl.Buffered(1).
            pl.BlockSpec((hp, 3 * hp), lambda b: (0, 0)),    # Wc (packed)
            pl.BlockSpec((kp, 3 * hp), lambda b: (0, 0)),    # W_other (packed)
            pl.BlockSpec((1, 3 * hp), lambda b: (0, 0)),     # b_cov (f32)
        ],
        out_specs=pl.BlockSpec((tile_n, hp), lambda b: (b, 0)),
        compiler_params=pltpu.CompilerParams(
            dimension_semantics=("parallel",),
            vmem_limit_bytes=vmem_limit,
        ),
    )(cov_p, x_other, packed["wc"], packed["w_other"], packed["b_cov"])

    return out[:n, :h]


def init_coverage_gru_params(rng, input_size, hidden_size):
    """Matches PyTorch init: every parameter ~ U(-1/sqrt(H), 1/sqrt(H)).
    Weights are stored transposed ([in, out]) for row-major matmul."""
    std = 1.0 / math.sqrt(hidden_size)
    ks = jax.random.split(rng, 8)

    def unif(k, shape):
        return jax.random.uniform(k, shape, jnp.float32, minval=-std, maxval=std)

    return {
        "wc_t": unif(ks[0], (hidden_size, 3 * hidden_size)),
        "b_cov": unif(ks[1], (1, 3 * hidden_size)),
        "wa_t": unif(ks[2], (1, 3 * hidden_size)),
        "b_att": unif(ks[3], (1, 3 * hidden_size)),
        "we_t": unif(ks[4], (input_size, 3 * hidden_size)),
        "b_en": unif(ks[5], (1, 3 * hidden_size)),
        "wd_t": unif(ks[6], (input_size, 3 * hidden_size)),
        "b_de": unif(ks[7], (1, 3 * hidden_size)),
    }


def _reference(coverage, attention, enHidden, deHidden, p):
    """Plain-JAX transliteration of the PyTorch forward (for the check)."""
    gc = coverage @ p["wc_t"] + p["b_cov"]
    ga = attention @ p["wa_t"] + p["b_att"]
    ge = enHidden @ p["we_t"] + p["b_en"]
    gd = deHidden @ p["wd_t"] + p["b_de"]
    cz, cr, cn = jnp.split(gc, 3, axis=-1)
    az, ar, an = jnp.split(ga, 3, axis=-1)
    ez, er, en_ = jnp.split(ge, 3, axis=-1)
    dz, dr, dn = jnp.split(gd, 3, axis=-1)
    z = jax.nn.sigmoid(cz + az + ez + dz)
    r = jax.nn.sigmoid(cr + ar + er + dr)
    new_cov = jnp.tanh(r * cn + an + en_ + dn)
    return (1.0 - z) * new_cov + z * coverage


if __name__ == "__main__":
    input_size = 32
    hidden_size = 32
    batch = 8

    root = jax.random.PRNGKey(0)
    k_p, k_c, k_a, k_e, k_d = jax.random.split(root, 5)

    params = init_coverage_gru_params(k_p, input_size, hidden_size)
    coverage = jax.random.normal(k_c, (batch, hidden_size), dtype=jnp.float32)
    attention = jax.random.normal(k_a, (batch, 1), dtype=jnp.float32)
    enHidden = jax.random.normal(k_e, (batch, input_size), dtype=jnp.float32)
    deHidden = jax.random.normal(k_d, (batch, input_size), dtype=jnp.float32)

    ref = _reference(coverage, attention, enHidden, deHidden, params)

    # 1) Exact-semantics check: f32 weights / activations end-to-end.
    packed32 = pack_coverage_gru_params(params, compute_dtype=jnp.float32)
    out32 = jax.block_until_ready(
        coverage_gru_forward(coverage, attention, enHidden, deHidden, packed32))
    assert out32.shape == (batch, hidden_size)
    assert jnp.allclose(out32, ref, atol=1e-4, rtol=1e-4)

    # 2) Default fast path: bf16 weights / streamed activations, f32 accumulate.
    packed_bf16 = pack_coverage_gru_params(params)  # bf16 default
    out_bf16 = jax.block_until_ready(
        coverage_gru_forward(coverage, attention, enHidden, deHidden, packed_bf16))

    def _cast(x):
        return x.astype(jnp.bfloat16).astype(jnp.float32)

    params_bf = {k: _cast(v) for k, v in params.items()}
    ref_bf = _reference(_cast(coverage), _cast(attention), _cast(enHidden),
                        _cast(deHidden), params_bf)
    assert out_bf16.shape == (batch, hidden_size)
    assert jnp.allclose(out_bf16, ref_bf, atol=2e-2, rtol=2e-2)

    print("KERNEL_OK")
</pallas_src>

<mosaic_0001>
module attributes {stable_mosaic.version = 11 : i64} {
  func.func @_coverage_gru_kernel(%arg0: i32, %arg1: memref<8x128xf32, #tpu.memory_space<vmem>>, %arg2: memref<8x72xf32, #tpu.memory_space<vmem>>, %arg3: memref<128x384xf32, #tpu.memory_space<vmem>>, %arg4: memref<72x384xf32, #tpu.memory_space<vmem>>, %arg5: memref<1x384xf32, #tpu.memory_space<vmem>>, %arg6: memref<8x128xf32, #tpu.memory_space<vmem>>) attributes {dimension_semantics = [#tpu.dimension_semantics<parallel>], iteration_bounds = array<i64: 1>, scalar_prefetch = 0 : i64, scratch_operands = 0 : i64, tpu.core_type = #tpu.core_type<tc>, window_params = [{transform_indices = @transform_0, window_bounds = array<i64: 8, 128>}, {transform_indices = @transform_1, window_bounds = array<i64: 8, 72>}, {pipeline_mode = #tpu.pipeline_mode<synchronous>, transform_indices = @transform_2, window_bounds = array<i64: 128, 384>}, {pipeline_mode = #tpu.pipeline_mode<synchronous>, transform_indices = @transform_3, window_bounds = array<i64: 72, 384>}, {pipeline_mode = #tpu.pipeline_mode<synchronous>, transform_indices = @transform_4, window_bounds = array<i64: 1, 384>}, {transform_indices = @transform_5, window_bounds = array<i64: 8, 128>}]} {
    %c0 = arith.constant 0 : index
    %c0_0 = arith.constant 0 : index
    %0 = vector.load %arg1[%c0, %c0_0] : memref<8x128xf32, #tpu.memory_space<vmem>>, vector<8x128xf32>
    %c0_1 = arith.constant 0 : index
    %c0_2 = arith.constant 0 : index
    %1 = vector.load %arg3[%c0_1, %c0_2] : memref<128x384xf32, #tpu.memory_space<vmem>>, vector<128x384xf32>
    %cst = arith.constant dense<0.000000e+00> : vector<8x384xf32>
    %2 = tpu.matmul %0, %1, %cst {dimension_numbers = #tpu.dot_dimension_numbers<[1], [0], [0], [1], [0, 0, 1, 1], [], []>} : vector<8x128xf32>, vector<128x384xf32>, vector<8x384xf32> -> vector<8x384xf32>
    %c0_3 = arith.constant 0 : index
    %c0_4 = arith.constant 0 : index
    %3 = vector.load %arg5[%c0_3, %c0_4] : memref<1x384xf32, #tpu.memory_space<vmem>>, vector<1x384xf32>
    %4 = vector.broadcast %3 : vector<1x384xf32> to vector<8x384xf32>
    %5 = arith.addf %2, %4 : vector<8x384xf32>
    %6 = vector.extract_strided_slice %5 {offsets = [0, 256], sizes = [8, 128], strides = [1, 1]} : vector<8x384xf32> to vector<8x128xf32>
    %c0_5 = arith.constant 0 : index
    %c0_6 = arith.constant 0 : index
    %7 = vector.load %arg2[%c0_5, %c0_6] : memref<8x72xf32, #tpu.memory_space<vmem>>, vector<8x72xf32>
    %c0_7 = arith.constant 0 : index
    %c0_8 = arith.constant 0 : index
    %8 = vector.load %arg4[%c0_7, %c0_8] : memref<72x384xf32, #tpu.memory_space<vmem>>, vector<72x384xf32>
    %cst_9 = arith.constant dense<0.000000e+00> : vector<8x384xf32>
    %9 = tpu.matmul %7, %8, %cst_9 {dimension_numbers = #tpu.dot_dimension_numbers<[1], [0], [0], [1], [0, 0, 1, 1], [], []>} : vector<8x72xf32>, vector<72x384xf32>, vector<8x384xf32> -> vector<8x384xf32>
    %10 = arith.addf %5, %9 : vector<8x384xf32>
    %11 = vector.extract_strided_slice %10 {offsets = [0, 0], sizes = [8, 128], strides = [1, 1]} : vector<8x384xf32> to vector<8x128xf32>
    %cst_10 = arith.constant 5.000000e-01 : f32
    %12 = vector.broadcast %cst_10 : f32 to vector<8x128xf32>
    %13 = arith.mulf %12, %11 : vector<8x128xf32>
    %14 = math.tanh %13 : vector<8x128xf32>
    %cst_11 = arith.constant 1.000000e+00 : f32
    %15 = vector.broadcast %cst_11 : f32 to vector<8x128xf32>
    %16 = arith.addf %14, %15 : vector<8x128xf32>
    %cst_12 = arith.constant 5.000000e-01 : f32
    %17 = vector.broadcast %cst_12 : f32 to vector<8x128xf32>
    %18 = arith.mulf %17, %16 : vector<8x128xf32>
    %19 = vector.extract_strided_slice %10 {offsets = [0, 128], sizes = [8, 128], strides = [1, 1]} : vector<8x384xf32> to vector<8x128xf32>
    %cst_13 = arith.constant 5.000000e-01 : f32
    %20 = vector.broadcast %cst_13 : f32 to vector<8x128xf32>
    %21 = arith.mulf %20, %19 : vector<8x128xf32>
    %22 = math.tanh %21 : vector<8x128xf32>
    %cst_14 = arith.constant 1.000000e+00 : f32
    %23 = vector.broadcast %cst_14 : f32 to vector<8x128xf32>
    %24 = arith.addf %22, %23 : vector<8x128xf32>
    %cst_15 = arith.constant 5.000000e-01 : f32
    %25 = vector.broadcast %cst_15 : f32 to vector<8x128xf32>
    %26 = arith.mulf %25, %24 : vector<8x128xf32>
    %cst_16 = arith.constant 1.000000e+00 : f32
    %27 = vector.broadcast %cst_16 : f32 to vector<8x128xf32>
    %28 = arith.subf %26, %27 : vector<8x128xf32>
    %29 = arith.mulf %28, %6 : vector<8x128xf32>
    %30 = vector.extract_strided_slice %10 {offsets = [0, 256], sizes = [8, 128], strides = [1, 1]} : vector<8x384xf32> to vector<8x128xf32>
    %31 = arith.addf %29, %30 : vector<8x128xf32>
    %32 = math.tanh %31 : vector<8x128xf32>
    %33 = arith.subf %32, %0 : vector<8x128xf32>
    %34 = arith.mulf %18, %33 : vector<8x128xf32>
    %35 = arith.subf %32, %34 : vector<8x128xf32>
    %c0_17 = arith.constant 0 : index
    %c0_18 = arith.constant 0 : index
    %36 = vector.load %arg6[%c0_17, %c0_18] : memref<8x128xf32, #tpu.memory_space<vmem>>, vector<8x128xf32>
    tpu.vector_store %arg6[%c0_17, %c0_18], %35 {strides = array<i32>} : memref<8x128xf32, #tpu.memory_space<vmem>>, vector<8x128xf32>,
    return
  }
  func.func @transform_0(%arg0: i32) -> (i32, i32) {
    %c0_i32 = arith.constant 0 : i32
    %c0_i32_0 = arith.constant 0 : i32
    return %arg0, %c0_i32 : i32, i32
  }
  func.func @transform_1(%arg0: i32) -> (i32, i32) {
    %c0_i32 = arith.constant 0 : i32
    %c0_i32_0 = arith.constant 0 : i32
    return %arg0, %c0_i32 : i32, i32
  }
  func.func @transform_2(%arg0: i32) -> (i32, i32) {
    %c0_i32 = arith.constant 0 : i32
    %c0_i32_0 = arith.constant 0 : i32
    %c0_i32_1 = arith.constant 0 : i32
    return %c0_i32, %c0_i32_0 : i32, i32
  }
  func.func @transform_3(%arg0: i32) -> (i32, i32) {
    %c0_i32 = arith.constant 0 : i32
    %c0_i32_0 = arith.constant 0 : i32
    %c0_i32_1 = arith.constant 0 : i32
    return %c0_i32, %c0_i32_0 : i32, i32
  }
  func.func @transform_4(%arg0: i32) -> (i32, i32) {
    %c0_i32 = arith.constant 0 : i32
    %c0_i32_0 = arith.constant 0 : i32
    %c0_i32_1 = arith.constant 0 : i32
    return %c0_i32, %c0_i32_0 : i32, i32
  }
  func.func @transform_5(%arg0: i32) -> (i32, i32) {
    %c0_i32 = arith.constant 0 : i32
    %c0_i32_0 = arith.constant 0 : i32
    return %arg0, %c0_i32 : i32, i32
  }
}

</mosaic_0001>

<bundles_post_ra>
// kernel: tpu_custom_call.1
= control target key start
LH: loop header
LB: loop body
LE: loop exit
PB: predicated region body
PF: predicated region fallthrough
CT: control target
= control target key end

     0   :  { %10 = vsyncpa [#allocation3], 0  ;;  %s923_s0 = inlined_call_operand.hbm [shape: f32[8,128], index: 0, kind: input, shape index: {}]   ;;  %s924_s1 = inlined_call_operand.hbm [shape: f32[8,72], index: 1, kind: input, shape index: {}]   ;;  %s925_s2 = inlined_call_operand.hbm [shape: f32[128,384], index: 2, kind: input, shape index: {}]   ;;  %s926_s3 = inlined_call_operand.hbm [shape: f32[72,384], index: 3, kind: input, shape index: {}]   ;;  %s927_s4 = inlined_call_operand.vmem [shape: f32[1,384], index: 4, kind: input, shape index: {}]   ;;  %s928_s5 = inlined_call_operand.hbm [shape: f32[8,128], index: 5, kind: output, shape index: {}]  }
   0x1   :  { %11 = vsyncpa [#allocation6], 0 }
   0x2   :  { %12 = vsyncpa [#allocation9], 0 }
   0x3   :  { %13 = vsyncpa [#allocation4], 0  ;;  %s796_s18 = smov [#allocation5]   ;;  %s797_s20 = smov [#allocation2]  }
   0x4   :  { %s30_s19 = sshll.u32 %s796_s18, 4  ;;  %s20_s21 = sshll.u32 %s797_s20, 4  ;;  %s31_s19 = int_to_ptr.vmem [resolvable:$true] %s30_s19  ;;  %s21_s21 = int_to_ptr.vmem [resolvable:$true] %s20_s21 }
   0x5   :  { %s678_s24 = scalar_lea.hbm %s924_s1, 128 }
   0x6   :  { %p679_p0 = scmp.ne.s32.totalorder %s924_s1, %s678_s24  ;;  %p682_p1 = scmp.lt.u32.totalorder %s678_s24, %s924_s1 }
   0x8   :  { %p684_p2 = pnand %p682_p1, %p679_p0 }
   0xa   :  { %687 = shalt.err (!%p684_p2)
}
   0xb   :  { %s688_s29 = scalar_lea.vmem %s31_s19, 128  ;;  %p693_p4 = scmp.lt.s32.totalorder %s31_s19, %s31_s19 }
   0xc   :  { %p689_p3 = scmp.ne.s32.totalorder %s31_s19, %s688_s29  ;;  %p694_p5 = scmp.lt.s32.totalorder %s688_s29, %s688_s29 }
   0xe   :  { %p695_p6 = por %p694_p5, %p693_p4 }
  0x10   :  { %p696_p7 = pnand %p695_p6, %p689_p3 }
  0x12   :  { %699 = shalt.err (!%p696_p7)
}
  0x13   :  { %33 = dma.hbm_to_vmem [thread:$0]  %s924_s1, 128, %s31_s19, [#allocation6]  }
  0x14   :  { %s700_s9 = scalar_lea.hbm %s923_s0, 128 }
  0x15   :  { %p701_p8 = scmp.ne.s32.totalorder %s923_s0, %s700_s9  ;;  %p704_p9 = scmp.lt.u32.totalorder %s700_s9, %s923_s0 }
  0x17   :  { %p706_p10 = pnand %p704_p9, %p701_p8 }
  0x19   :  { %709 = shalt.err (!%p706_p10)
}
  0x1a   :  { %s710_s14 = scalar_lea.vmem %s21_s21, 128  ;;  %p715_p12 = scmp.lt.s32.totalorder %s21_s21, %s21_s21 }
  0x1b   :  { %p711_p11 = scmp.ne.s32.totalorder %s21_s21, %s710_s14  ;;  %p716_p13 = scmp.lt.s32.totalorder %s710_s14, %s710_s14 }
  0x1d   :  { %p717_p0 = por %p716_p13, %p715_p12 }
  0x1f   :  { %p718_p1 = pnand %p717_p0, %p711_p11 }
  0x21   :  { %721 = shalt.err (!%p718_p1)
}
  0x22   :  { %23 = dma.hbm_to_vmem [thread:$0]  %s923_s0, 128, %s21_s21, [#allocation3]  }
  0x23   :  { %s798_s16 = smov [#allocation7]   ;;  %s722_s20 = scalar_lea.hbm %s925_s2, 6144 }
  0x24   :  { %s39_s17 = sshll.u32 %s798_s16, 4  ;;  %p723_p2 = scmp.ne.s32.totalorder %s925_s2, %s722_s20  ;;  %s40_s17 = int_to_ptr.vmem [resolvable:$true] %s39_s17 }
  0x25   :  { %p726_p3 = scmp.lt.u32.totalorder %s722_s20, %s925_s2 }
  0x27   :  { %p728_p4 = pnand %p726_p3, %p723_p2 }
  0x29   :  { %731 = shalt.err (!%p728_p4)
}
  0x2a   :  { %s732_s26 = scalar_lea.vmem %s40_s17, 6144  ;;  %p737_p6 = scmp.lt.s32.totalorder %s40_s17, %s40_s17 }
  0x2b   :  { %p733_p5 = scmp.ne.s32.totalorder %s40_s17, %s732_s26  ;;  %p738_p7 = scmp.lt.s32.totalorder %s732_s26, %s732_s26 }
  0x2d   :  { %p739_p8 = por %p738_p7, %p737_p6 }
  0x2f   :  { %p740_p9 = pnand %p739_p8, %p733_p5 }
  0x31   :  { %743 = shalt.err (!%p740_p9)
}
  0x32   :  { %s799_s0 = smov 384   ;;  %s800_s21 = smov 24  }
  0x33   :  { %45 = dma.hbm_to_vmem [thread:$0]  %s925_s2, 6144, %s40_s17, [#allocation6], %s799_s0, %s799_s0, %s800_s21  }
  0x34   :  { %s801_s29 = smov [#allocation8]   ;;  %s744_s8 = scalar_lea.hbm %s926_s3, 3456 }
  0x35   :  { %s51_s30 = sshll.u32 %s801_s29, 4  ;;  %p745_p10 = scmp.ne.s32.totalorder %s926_s3, %s744_s8  ;;  %s52_s30 = int_to_ptr.vmem [resolvable:$true] %s51_s30 }
  0x36   :  { %p748_p11 = scmp.lt.u32.totalorder %s744_s8, %s926_s3 }
  0x38   :  { %p750_p12 = pnand %p748_p11, %p745_p10 }
  0x3a   :  { %753 = shalt.err (!%p750_p12)
}
  0x3b   :  { %s754_s13 = scalar_lea.vmem %s52_s30, 3456  ;;  %p759_p0 = scmp.lt.s32.totalorder %s52_s30, %s52_s30 }
  0x3c   :  { %p755_p13 = scmp.ne.s32.totalorder %s52_s30, %s754_s13  ;;  %p760_p1 = scmp.lt.s32.totalorder %s754_s13, %s754_s13 }
  0x3e   :  { %p761_p2 = por %p760_p1, %p759_p0 }
  0x40   :  { %p762_p3 = pnand %p761_p2, %p755_p13 }
  0x42   :  { %765 = shalt.err (!%p762_p3)
}
  0x43   :  { %57 = dma.hbm_to_vmem [thread:$0]  %s926_s3, 3456, %s52_s30, [#allocation9], %s799_s0, %s799_s0, %s800_s21  }
  0x44   :  { %788 = dma.done.wait [#allocation3], 128  }
  0x45   :  { %789 = vsyncadd [#allocation3], 4294967168 }
  0x46   :  { %790 = dma.done.wait [#allocation6], 6272  }
  0x47   :  { %791 = vsyncadd [#allocation6], 4294961024 }
  0x48   :  { %792 = dma.done.wait [#allocation9], 3456  }
  0x49   :  { %793 = vsyncadd [#allocation9], 4294963840  ;;  %v802_v0 = vmov 0.0|0.0   ;;  %v803_v1 = vmov 0.0   ;;  %vm804_vm0 = vmmov 0   ;;  %v74_v2 = vld [vmem:[#allocation7 + $0x8] sm:$0xff] }
  0x4a   :  { %606 = vmatprep.subr.bf16.mxu1 %v802_v0  ;;  %202 = vmatprep.mubr.f32.mxu0 %v803_v1  ;;  %v77_v3 = vld [vmem:[#allocation7 + $0x20] sm:$0xff]  ;;  %v76_v6 = vld [vmem:[#allocation7 + $0x18] sm:$0xff]  ;;  %v83_v8 = vld [vmem:[#allocation7 + $0x50] sm:$0xff]  ;;  %vm307_vm1 = vcmask 588800  }
  0x4b   :  { %550 = vmatprep.mubr.msk.f32.mxu1 %vm804_vm0, %v803_v1  ;;  %v73_v4 = vld [vmem:[#allocation7] sm:$0xff]  ;;  %v574_v5 = vpack.c.bf16 %v77_v3, %v74_v2  ;;  %v80_v7 = vld [vmem:[#allocation7 + $0x38] sm:$0xff]  ;;  %v79_v11 = vld [vmem:[#allocation7 + $0x30] sm:$0xff] }
  0x4c   :  { %v576_v9 = vpack.c.bf16 %v76_v6, %v73_v4  ;;  %v578_v10 = vpack.c.bf16 %v83_v8, %v80_v7  ;;  %v82_v12 = vld [vmem:[#allocation7 + $0x48] sm:$0xff]  ;;  %v89_v14 = vld [vmem:[#allocation7 + $0x80] sm:$0xff]  ;;  %v75_v15 = vld [vmem:[#allocation7 + $0x10] sm:$0xff] }
  0x4d   :  { %v86_v13 = vld [vmem:[#allocation7 + $0x68] sm:$0xff]  ;;  %575 = vmatprep.subr.bf16.mxu0 %v574_v5  ;;  %v580_v17 = vpack.c.bf16 %v82_v12, %v79_v11  ;;  %v85_v19 = vld [vmem:[#allocation7 + $0x60] sm:$0xff]  ;;  %v88_v21 = vld [vmem:[#allocation7 + $0x78] sm:$0xff] }
  0x4e   :  { %v78_v16 = vld [vmem:[#allocation7 + $0x28] sm:$0xff]  ;;  %577 = vmatpush1.bf16.msra.mxu0 %v576_v9  ;;  %v582_v20 = vpack.c.bf16 %v89_v14, %v86_v13  ;;  %v81_v22 = vld [vmem:[#allocation7 + $0x40] sm:$0xff]  ;;  %v84_v23 = vld [vmem:[#allocation7 + $0x58] sm:$0xff]  ;;  %v584_v29 = vpack.c.bf16 %v88_v21, %v85_v19 }
  0x4f   :  { %v607_v18 = vpack.c.bf16 %v78_v16, %v75_v15  ;;  %579 = vmatprep.subr.bf16.mxu0 %v578_v10  ;;  %v92_v24 = vld [vmem:[#allocation7 + $0x98] sm:$0xff]  ;;  %v95_v25 = vld [vmem:[#allocation7 + $0xb0] sm:$0xff]  ;;  %v610_v26 = vpack.c.bf16 %v84_v23, %v81_v22  ;;  %v90_v28 = vld [vmem:[#allocation7 + $0x88] sm:$0xff] }
  0x50   :  { %v87_v27 = vld [vmem:[#allocation7 + $0x70] sm:$0xff]  ;;  %v586_v30 = vpack.c.bf16 %v95_v25, %v92_v24  ;;  %v94_v32 = vld [vmem:[#allocation7 + $0xa8] sm:$0xff]  ;;  %v101_v34 = vld [vmem:[#allocation7 + $0xe0] sm:$0xff] }
  0x51   :  { %608 = vmatpush3.bf16.msra.mxu1 %v607_v18  ;;  %v91_v31 = vld [vmem:[#allocation7 + $0x90] sm:$0xff]  ;;  %v98_v33 = vld [vmem:[#allocation7 + $0xc8] sm:$0xff]  ;;  %v613_v35 = vpack.c.bf16 %v90_v28, %v87_v27  ;;  %v93_v36 = vld [vmem:[#allocation7 + $0xa0] sm:$0xff] }
  0x52   :  { %609 = vmatprep.subr.bf16.mxu1 %v802_v0  ;;  %581 = vmatpush1.bf16.msra.mxu0 %v580_v17  ;;  %v96_v37 = vld [vmem:[#allocation7 + $0xb8] sm:$0xff]  ;;  %v588_v38 = vpack.c.bf16 %v94_v32, %v91_v31  ;;  %v590_v39 = vpack.c.bf16 %v101_v34, %v98_v33  ;;  %v97_v40 = vld [vmem:[#allocation7 + $0xc0] sm:$0xff]  ;;  %v107_v43 = vld [vmem:[#allocation7 + $0x110] sm:$0xff] }
  0x53   :  { %583 = vmatprep.subr.bf16.mxu0 %v582_v20  ;;  %v100_v41 = vld [vmem:[#allocation7 + $0xd8] sm:$0xff]  ;;  %v616_v44 = vpack.c.bf16 %v96_v37, %v93_v36  ;;  %v99_v45 = vld [vmem:[#allocation7 + $0xd0] sm:$0xff]  ;;  %v102_v46 = vld [vmem:[#allocation7 + $0xe8] sm:$0xff] }
  0x54   :  { %v104_v42 = vld [vmem:[#allocation7 + $0xf8] sm:$0xff]  ;;  %v592_v47 = vpack.c.bf16 %v100_v41, %v97_v40  ;;  %v103_v49 = vld [vmem:[#allocation7 + $0xf0] sm:$0xff]  ;;  %v106_v50 = vld [vmem:[#allocation7 + $0x108] sm:$0xff]  ;;  %v619_v53 = vpack.c.bf16 %v102_v46, %v99_v45 }
  0x55   :  { %611 = vmatpush3.bf16.msra.mxu1 %v610_v26  ;;  %v594_v48 = vpack.c.bf16 %v107_v43, %v104_v42  ;;  %v110_v51 = vld [vmem:[#allocation7 + $0x128] sm:$0xff]  ;;  %v113_v52 = vld [vmem:[#allocation7 + $0x140] sm:$0xff]  ;;  %v108_v55 = vld [vmem:[#allocation7 + $0x118] sm:$0xff]  ;;  %v596_v56 = vpack.c.bf16 %v106_v50, %v103_v49 }
  0x56   :  { %612 = vmatprep.subr.bf16.mxu1 %v802_v0  ;;  %585 = vmatpush1.bf16.msra.mxu0 %v584_v29  ;;  %v105_v54 = vld [vmem:[#allocation7 + $0x100] sm:$0xff]  ;;  %v598_v57 = vpack.c.bf16 %v113_v52, %v110_v51  ;;  %v112_v59 = vld [vmem:[#allocation7 + $0x138] sm:$0xff]  ;;  %v119_v61 = vld [vmem:[#allocation7 + $0x170] sm:$0xff] }
  0x57   :  { %587 = vmatprep.subr.bf16.mxu0 %v586_v30  ;;  %v109_v58 = vld [vmem:[#allocation7 + $0x120] sm:$0xff]  ;;  %v116_v60 = vld [vmem:[#allocation7 + $0x158] sm:$0xff]  ;;  %v622_v62 = vpack.c.bf16 %v108_v55, %v105_v54  ;;  %v111_v63 = vld [vmem:[#allocation7 + $0x130] sm:$0xff]  ;;  %v123_v54 = vlaneseq }
  0x58   :  { %v114_v2 = vld [vmem:[#allocation7 + $0x148] sm:$0xff]  ;;  %v600_v3 = vpack.c.bf16 %v112_v59, %v109_v58  ;;  %v602_v4 = vpack.c.bf16 %v119_v61, %v116_v60  ;;  %v115_v5 = vld [vmem:[#allocation7 + $0x150] sm:$0xff]  ;;  %v284_v9 = vld [vmem:[#allocation8 + $0x20] sm:$0xff] }
  0x59   :  { %614 = vmatpush3.bf16.msra.mxu1 %v613_v35  ;;  %v118_v6 = vld [vmem:[#allocation7 + $0x168] sm:$0xff]  ;;  %v625_v7 = vpack.c.bf16 %v114_v2, %v111_v63  ;;  %v117_v10 = vld [vmem:[#allocation7 + $0x160] sm:$0xff]  ;;  %v120_v11 = vld [vmem:[#allocation7 + $0x178] sm:$0xff] }
  0x5a   :  { %615 = vmatprep.subr.bf16.mxu1 %v802_v0  ;;  %589 = vmatpush1.bf16.msra.mxu0 %v588_v38  ;;  %v281_v8 = vld [vmem:[#allocation8 + $0x8] sm:$0xff]  ;;  %v604_v12 = vpack.c.bf16 %v118_v6, %v115_v5  ;;  %v280_v14 = vld [vmem:[#allocation8] sm:$0xff]  ;;  %v283_v15 = vld [vmem:[#allocation8 + $0x18] sm:$0xff]  ;;  %v628_v16 = vpack.c.bf16 %v120_v11, %v117_v10 }
  0x5b   :  { %591 = vmatprep.subr.bf16.mxu0 %v590_v39  ;;  %v630_v13 = vpack.c.bf16 %v284_v9, %v281_v8  ;;  %v287_v17 = vld [vmem:[#allocation8 + $0x38] sm:$0xff]  ;;  %v290_v18 = vld [vmem:[#allocation8 + $0x50] sm:$0xff]  ;;  %v285_v20 = vld [vmem:[#allocation8 + $0x28] sm:$0xff]  ;;  %v632_v22 = vpack.c.bf16 %v283_v15, %v280_v14 }
  0x5c   :  { %v282_v19 = vld [vmem:[#allocation8 + $0x10] sm:$0xff]  ;;  %v634_v23 = vpack.c.bf16 %v290_v18, %v287_v17  ;;  %v289_v25 = vld [vmem:[#allocation8 + $0x48] sm:$0xff]  ;;  %v296_v27 = vld [vmem:[#allocation8 + $0x80] sm:$0xff] }
  0x5d   :  { %617 = vmatpush3.bf16.msra.mxu1 %v616_v44  ;;  %v895_v21 = vld [vmem:[#allocation2] sm:$0xff]  ;;  %v293_v26 = vld [vmem:[#allocation8 + $0x68] sm:$0xff]  ;;  %v647_v28 = vpack.c.bf16 %v285_v20, %v282_v19  ;;  %v288_v29 = vld [vmem:[#allocation8 + $0x40] sm:$0xff] }
  0x5e   :  { %618 = vmatprep.subr.bf16.mxu1 %v802_v0  ;;  %593 = vmatpush1.bf16.msra.mxu0 %v592_v47  ;;  %v286_v24 = vld [vmem:[#allocation8 + $0x30] sm:$0xff]  ;;  %v291_v30 = vld [vmem:[#allocation8 + $0x58] sm:$0xff]  ;;  %v638_v32 = vpack.c.bf16 %v296_v27, %v293_v26  ;;  %v292_v33 = vld [vmem:[#allocation8 + $0x60] sm:$0xff] }
  0x5f   :  { %595 = vmatprep.subr.bf16.mxu0 %v594_v48  ;;  %v636_v31 = vpack.c.bf16 %v289_v25, %v286_v24  ;;  %v295_v34 = vld [vmem:[#allocation8 + $0x78] sm:$0xff]  ;;  %v302_v36 = vld [vmem:[#allocation8 + $0xb0] sm:$0xff]  ;;  %v650_v37 = vpack.c.bf16 %v291_v30, %v288_v29  ;;  %v297_v39 = vld [vmem:[#allocation8 + $0x88] sm:$0xff] }
  0x60   :  { %v299_v35 = vld [vmem:[#allocation8 + $0x98] sm:$0xff]  ;;  %v294_v38 = vld [vmem:[#allocation8 + $0x70] sm:$0xff]  ;;  %v640_v40 = vpack.c.bf16 %v295_v34, %v292_v33  ;;  %v301_v43 = vld [vmem:[#allocation8 + $0xa8] sm:$0xff] }
  0x61   :  { %620 = vmatpush3.bf16.msra.mxu1 %v619_v53  ;;  %v642_v41 = vpack.c.bf16 %v302_v36, %v299_v35  ;;  %v298_v42 = vld [vmem:[#allocation8 + $0x90] sm:$0xff]  ;;  %v653_v44 = vpack.c.bf16 %v297_v39, %v294_v38  ;;  %v300_v45 = vld [vmem:[#allocation8 + $0xa0] sm:$0xff]  ;;  %v303_v46 = vld [vmem:[#allocation8 + $0xb8] sm:$0xff] }
  0x62   :  { %621 = vmatprep.subr.bf16.mxu1 %v802_v0  ;;  %597 = vmatpush1.bf16.msra.mxu0 %v596_v56  ;;  %v644_v47 = vpack.c.bf16 %v301_v43, %v298_v42  ;;  %v305_v48 = vld [vmem:[#allocation8 + $0xc8] sm:$0xff]  ;;  %v656_v49 = vpack.c.bf16 %v303_v46, %v300_v45  ;;  %v304_v50 = vld [vmem:[#allocation8 + $0xc0] sm:$0xff]  ;;  %v279_v51 = vld [vmem:[#allocation5] sm:$0xff]  ;;  %v124_v56 = vshrl.u32 %v123_v54, 7 }
  0x63   :  { %599 = vmatprep.subr.bf16.mxu0 %v598_v57  ;;  %v306_v52 = vld [vmem:[#allocation8 + $0xd0] sm:$0xff] }
  0x64   :  { %v133_v57 = vsub.s32 2, %v124_v56  ;;  %v129_v58 = vsub.s32 1, %v124_v56  ;;  %v125_v6 = vsub.s32 0, %v124_v56 }
  0x65   :  { %623 = vmatpush3.bf16.msra.mxu1 %v622_v62 }
  0x66   :  { %624 = vmatprep.subr.bf16.mxu1 %v802_v0  ;;  %601 = vmatpush1.bf16.msra.mxu0 %v600_v3 }
  0x67   :  { %603 = vmatprep.subr.bf16.mxu0 %v602_v4 }
  0x69   :  { %626 = vmatpush3.bf16.msra.mxu1 %v625_v7 }
  0x6a   :  { %627 = vmatprep.subr.bf16.mxu1 %v802_v0  ;;  %605 = vmatpush1.bf16.msra.mxu0 %v604_v12 }
  0x6b   :  { %631 = vmatprep.subr.bf16.mxu0 %v630_v13 }
  0x6d   :  { %629 = vmatpush3.bf16.msra.mxu1 %v628_v16  ;;  %203 = vmatmul.mubr.f32.vlgmr.msra.gmra.mrb[0].mxu0 %v895_v21 }
  0x6e   :  { %646 = vmatprep.subr.bf16.mxu1 %v802_v0  ;;  %633 = vmatpush1.bf16.msra.mxu0 %v632_v22 }
  0x6f   :  { %375 = vmatprep.mubr.f32.mxu0 %v803_v1  ;;  %635 = vmatprep.subr.bf16.mxu0 %v634_v23 }
  0x70   :  { %551 = vmatmul.mubr.f32.vlgmr.msra.gmra.mrb[0].mxu1 %v895_v21 }
  0x71   :  { %648 = vmatpush3.bf16.msra.mxu1 %v647_v28  ;;  %571 = vmatprep.mubr.msk.f32.mxu1 %vm804_vm0, %v803_v1 }
  0x72   :  { %649 = vmatprep.subr.bf16.mxu1 %v802_v0  ;;  %637 = vmatpush1.bf16.msra.mxu0 %v636_v31 }
  0x73   :  { %639 = vmatprep.subr.bf16.mxu0 %v638_v32 }
  0x75   :  { %651 = vmatpush3.bf16.msra.mxu1 %v650_v37 }
  0x76   :  { %652 = vmatprep.subr.bf16.mxu1 %v802_v0  ;;  %641 = vmatpush1.bf16.msra.mxu0 %v640_v40 }
  0x77   :  { %643 = vmatprep.subr.bf16.mxu0 %v642_v41 }
  0x79   :  { %654 = vmatpush3.bf16.msra.mxu1 %v653_v44 }
  0x7a   :  { %655 = vmatprep.subr.bf16.mxu1 %v802_v0  ;;  %645 = vmatpush1.bf16.msra.mxu0 %v644_v47  ;;  %v121_v0 = vld [vmem:[%s927_s4] sm:$0x7]  ;;  %s805_s4 = smov [#allocation10]  }
  0x7b   :  { %327 = vmatprep.subr.mxu0 %v305_v48  ;;  %v134_v59 = vrot.slane %v121_v0, %v133_v57  ;;  %v130_v60 = vrot.slane %v121_v0, %v129_v58  ;;  %v126_v7 = vrot.slane %v121_v0, %v125_v6  ;;  %s477_s15 = sshll.u32 %s805_s4, 4  ;;  %s478_s15 = int_to_ptr.vmem [resolvable:$true] %s477_s15 }
  0x7c   :  { %s766_s16 = scalar_lea.vmem %s478_s15, 128  ;;  %p771_p5 = scmp.lt.s32.totalorder %s478_s15, %s478_s15 }
  0x7d   :  { %657 = vmatpush3.bf16.msra.mxu1 %v656_v49  ;;  %p767_p4 = scmp.ne.s32.totalorder %s478_s15, %s766_s16  ;;  %p772_p6 = scmp.lt.s32.totalorder %s766_s16, %s766_s16 }
  0x7e   :  { %569 = vmatprep.subr.mxu1 %v803_v1  ;;  %328 = vmatpush1.msra.mxu0 %v304_v50 }
  0x7f   :  { %488 = vmatmul.mubr.msk.f32.vlgmr.msra.gmra.mrb[0].mxu0 %vm307_vm1, %v279_v51  ;;  %p773_p7 = por %p772_p6, %p771_p5 }
  0x81   :  { %570 = vmatpush3.msra.mxu1 %v306_v52  ;;  %p774_p8 = pnand %p773_p7, %p767_p4 }
  0x82   :  { %572 = vmatmul.mubr.msk.f32.vlgmr.msra.gmra.mrb[2].mxu1 %vm307_vm1, %v279_v51 }
 0x143   :  { %v275_v53 = vpop.f32.mrb[0].mxu1 }
 0x144   :  { %v552_v55 = vpop.f32.mrb[1].mxu1  ;;  %v276_v61 = vadd.f32 %v275_v53, %v134_v59 }
 0x152   :  { %v377_v62 = vpop.f32.mrb[0].mxu0 }
 0x153   :  { %v379_v1 = vpop.f32.mrb[1].mxu0  ;;  %v658_v8 = vadd.f32 %v377_v62, %v126_v7 }
 0x154   :  { %v659_v63 = vadd.f32 %v379_v1, %v130_v60 }
 0x155   :  { %v448_v2 = vpop.f32.mrb[2].mxu1  ;;  %v455_v10 = vmul.f32 0.5, %v658_v8 }
 0x156   :  { %v454_v3 = vadd.f32 %v448_v2, %v276_v61  ;;  %v573_v4 = vpop.f32.mrb[3].mxu1  ;;  %v459_v5 = vmul.f32 0.5, %v659_v63 }
 0x158   :  { %672 = vtanh.f32 %v459_v5 }
 0x159   :  { %674 = vtanh.f32 %v455_v10 }
 0x162   :  { %v673_v9 = vpop.eup %672 }
 0x163   :  { %v461_v11 = vadd.f32 1.0, %v673_v9  ;;  %v675_v16 = vpop.eup %674 }
 0x164   :  { %v457_v17 = vadd.f32 1.0, %v675_v16 }
 0x165   :  { %v462_v12 = vmul.f32 0.5, %v461_v11 }
 0x166   :  { %v458_v19 = vmul.f32 0.5, %v457_v17 }
 0x167   :  { %v490_v13 = vadd.f32 -1.0, %v462_v12 }
 0x169   :  { %v464_v14 = vmul.f32 %v490_v13, %v276_v61 }
 0x16b   :  { %v465_v15 = vadd.f32 %v464_v14, %v454_v3 }
 0x16d   :  { %676 = vtanh.f32 %v465_v15 }
 0x177   :  { %v677_v18 = vpop.eup %676 }
 0x178   :  { %v467_v20 = vsub.f32 %v677_v18, %v895_v21 }
 0x17a   :  { %v468_v22 = vmul.f32 %v467_v20, %v458_v19 }
 0x17c   :  { %v469_v23 = vsub.f32 %v677_v18, %v468_v22 }
 0x17e   :  { %470 = vst [vmem:[#allocation10] sm:$0xff] %v469_v23 }
 0x17f   :  { %777 = shalt.err (!%p774_p8)
}
 0x180   :  { %s778_s19 = scalar_lea.hbm %s928_s5, 128 }
 0x181   :  { %p779_p9 = scmp.ne.s32.totalorder %s928_s5, %s778_s19  ;;  %p782_p10 = scmp.lt.u32.totalorder %s778_s19, %s928_s5 }
 0x183   :  { %p784_p11 = pnand %p782_p10, %p779_p9 }
 0x185   :  { %787 = shalt.err (!%p784_p11)
}
 0x186   :  { %480 = dma.vmem_to_hbm [thread:$0]  %s478_s15, 128, %s928_s5, [#allocation4]  }
 0x187   :  { %794 = dma.done.wait [#allocation4], 128  }
 0x188   :  { %795 = vsyncadd [#allocation4], 4294967168 }
 0x189   :  { %484 = vsyncpa [#allocation3], 1 }
 0x18a   :  { %485 = vsyncpa [#allocation6], 1 }
 0x18b   :  { %486 = vsyncpa [#allocation9], 1 }
 0x18c   :  { %487 = vsyncpa [#allocation4], 1 }

</bundles_post_ra>
